<compile_context>
chip_gen: v7x
topology: tpu7x:2x2x1
jax: 0.10.0
libtpu: 0.0.40
codegen_flags: <defaults>
</compile_context>

<pallas_src>
import functools

import jax
import jax.numpy as jnp
from jax.experimental import pallas as pl
from jax.experimental.pallas import tpu as pltpu

LN_EPS = 1e-5  # nn.LayerNorm default eps


def _round_up(x, m):
    return (x + m - 1) // m * m


def _cdiv(a, b):
    return (a + b - 1) // b


def _nbytes(shape, dtype):
    n = 1
    for d in shape:
        n *= int(d)
    return n * jnp.dtype(dtype).itemsize


def _layernorm_fused(h, gamma, beta, n):
    """Single-pass LayerNorm over the real feature count `n`.

    `h` may be lane-padded beyond `n`; padded columns are exactly zero (zero
    weight columns + zero bias), so sums over the padded width are correct,
    and zero gamma/beta in the pad keep padded columns at zero afterwards."""
    s1 = jnp.sum(h, axis=-1, keepdims=True)
    s2 = jnp.sum(h * h, axis=-1, keepdims=True)
    mean = s1 * (1.0 / n)
    var = jnp.maximum(s2 * (1.0 / n) - mean * mean, 0.0)
    return (h - mean) * jax.lax.rsqrt(var + LN_EPS) * gamma + beta


def actor_kernel(x_ref,
                 w1_ref, p1_ref,
                 w2_ref, p2_ref,
                 wm_ref, bm_ref,
                 out_ref, *, n1, n2):
    # state arrives in f32; cast to bf16 here (MXU-native, rides VPU slack).
    x = x_ref[...].astype(jnp.bfloat16)                               # (TB, IN)

    # fc1 -> LayerNorm -> ReLU   (p1 rows: 0=bias, 1=gamma, 2=beta)
    h = jnp.dot(x, w1_ref[...], preferred_element_type=jnp.float32)
    h = h + p1_ref[0:1, :]
    h = _layernorm_fused(h, p1_ref[1:2, :], p1_ref[2:3, :], n1)
    h = jnp.maximum(h, 0.0)

    # fc2 -> LayerNorm -> ReLU
    h = jnp.dot(h.astype(jnp.bfloat16), w2_ref[...],
                preferred_element_type=jnp.float32)
    h = h + p2_ref[0:1, :]
    h = _layernorm_fused(h, p2_ref[1:2, :], p2_ref[2:3, :], n2)
    h = jnp.maximum(h, 0.0)

    # mu -> tanh  (output columns lane-padded; padded cols are exactly 0)
    h = jnp.dot(h.astype(jnp.bfloat16), wm_ref[...],
                preferred_element_type=jnp.float32)
    h = h + bm_ref[...]
    out_ref[...] = jnp.tanh(h).astype(out_ref.dtype)                  # bf16 store


def pack_params(params):
    """Pack raw f32 params for the kernel:
       - weights cast to bf16, pre-transposed (in, out),
       - (bias, gamma, beta) stacked into one (3, N) f32 array per layer,
       - hidden dims and action dim zero-padded to multiples of 128 lanes."""
    (w1, b1, g1, be1, w2, b2, g2, be2, wm, bm) = params
    in_dims, h1 = w1.shape
    h2 = w2.shape[1]
    a = wm.shape[1]
    h1p = _round_up(h1, 128)
    h2p = _round_up(h2, 128)
    ap = _round_up(a, 128)

    w1p = jnp.pad(w1, ((0, 0), (0, h1p - h1)))
    p1 = jnp.pad(jnp.concatenate([b1, g1, be1], axis=0),
                 ((0, 0), (0, h1p - h1))).astype(jnp.float32)          # (3, H1p)
    w2p = jnp.pad(w2, ((0, h1p - h1), (0, h2p - h2)))
    p2 = jnp.pad(jnp.concatenate([b2, g2, be2], axis=0),
                 ((0, 0), (0, h2p - h2))).astype(jnp.float32)          # (3, H2p)
    wmp = jnp.pad(wm, ((0, h2p - h2), (0, ap - a)))
    bmp = jnp.pad(bm, ((0, 0), (0, ap - a))).astype(jnp.float32)

    return (w1p.astype(jnp.bfloat16), p1,
            w2p.astype(jnp.bfloat16), p2,
            wmp.astype(jnp.bfloat16), bmp,
            (h1, h2, a))


def _vmem_capacity_bytes():
    try:
        return int(pltpu.get_tpu_info().vmem_capacity_bytes)
    except Exception:
        return 64 << 20  # conservative fallback (v7x per-TC VMEM)


def actor_forward(state, packed, *, batch_tile=512):
    w1, p1, w2, p2, wm, bm, (h1, h2, n_actions) = packed
    B, IN = state.shape
    H1p = w1.shape[1]
    H2p = w2.shape[1]
    Ap = wm.shape[1]

    # Remainder-aware batch tiling: split B into roughly equal tiles (<= batch
    # tile) rounded to 16 rows.  Force >= 2 grid steps when there's enough work
    # so v7x's two TensorCores are both used (neutral on v5e/v6e).
    num_tiles = _cdiv(B, batch_tile)
    if B >= 32 and num_tiles < 2:
        num_tiles = 2
    TB = _round_up(_cdiv(B, num_tiles), 16)
    B_pad = num_tiles * TB

    x = state  # f32 in; cast to bf16 inside the kernel (no wrapper cast pass)
    if B_pad != B:
        x = jnp.pad(x, ((0, B_pad - B), (0, 0)))

    grid = (num_tiles,)

    def resident(arr):
        # full block, constant index -> stays VMEM-resident across batch steps
        return pl.BlockSpec(arr.shape, lambda i: (0,) * arr.ndim)

    # VMEM budget: inputs/outputs are double-buffered by the pipeline (~2x);
    # use a 4x safety factor with headroom below physical capacity.
    per_step = (_nbytes((TB, IN), state.dtype)
                + _nbytes(w1.shape, jnp.bfloat16) + _nbytes(p1.shape, jnp.float32)
                + _nbytes(w2.shape, jnp.bfloat16) + _nbytes(p2.shape, jnp.float32)
                + _nbytes(wm.shape, jnp.bfloat16) + _nbytes(bm.shape, jnp.float32)
                + _nbytes((TB, Ap), jnp.bfloat16))
    vmem_cap = int(_vmem_capacity_bytes() * 0.85)   # headroom for compiler scratch
    vmem_limit = int(min(max(4 * per_step, 32 << 20), vmem_cap))

    cost = pl.CostEstimate(
        flops=2 * B_pad * (IN * H1p + H1p * H2p + H2p * Ap),
        transcendentals=B_pad * (2 + Ap),            # 2 rsqrt/row + tanh/out
        bytes_accessed=(_nbytes((B_pad, IN), state.dtype)
                        + _nbytes(w1.shape, jnp.bfloat16)
                        + _nbytes(p1.shape, jnp.float32)
                        + _nbytes(w2.shape, jnp.bfloat16)
                        + _nbytes(p2.shape, jnp.float32)
                        + _nbytes(wm.shape, jnp.bfloat16)
                        + _nbytes(bm.shape, jnp.float32)
                        + _nbytes((B_pad, Ap), jnp.bfloat16)),
    )

    kernel = functools.partial(actor_kernel, n1=h1, n2=h2)

    out = pl.pallas_call(
        kernel,
        out_shape=jax.ShapeDtypeStruct((B_pad, Ap), jnp.bfloat16),
        grid=grid,
        in_specs=[pl.BlockSpec((TB, IN), lambda i: (i, 0)),
                  resident(w1), resident(p1),
                  resident(w2), resident(p2),
                  resident(wm), resident(bm)],
        out_specs=pl.BlockSpec((TB, Ap), lambda i: (i, 0)),
        compiler_params=pltpu.CompilerParams(
            dimension_semantics=("parallel",),
            vmem_limit_bytes=vmem_limit),
        cost_estimate=cost,
    )(x, w1, p1, w2, p2, wm, bm)

    return out[:B, :n_actions].astype(jnp.float32)


def init_params(key, input_dims, fc1_dims, fc2_dims, n_actions):
    """Deterministic init mirroring the module's custom uniform init ranges.
    Weights stored as (in, out) (pre-transposed for x @ W)."""
    ks = jax.random.split(key, 6)
    f1 = 1.0 / jnp.sqrt(jnp.float32(fc1_dims))
    f2 = 1.0 / jnp.sqrt(jnp.float32(fc2_dims))
    f3 = 0.003

    w1 = jax.random.uniform(ks[0], (input_dims, fc1_dims), jnp.float32, -f1, f1)
    b1 = jax.random.uniform(ks[1], (1, fc1_dims), jnp.float32, -f1, f1)
    w2 = jax.random.uniform(ks[2], (fc1_dims, fc2_dims), jnp.float32, -f2, f2)
    b2 = jax.random.uniform(ks[3], (1, fc2_dims), jnp.float32, -f2, f2)
    wm = jax.random.uniform(ks[4], (fc2_dims, n_actions), jnp.float32, -f3, f3)
    bm = jax.random.uniform(ks[5], (1, n_actions), jnp.float32, -f3, f3)

    # LayerNorm affine params (PyTorch defaults: gamma=1, beta=0)
    g1 = jnp.ones((1, fc1_dims), jnp.float32)
    be1 = jnp.zeros((1, fc1_dims), jnp.float32)
    g2 = jnp.ones((1, fc2_dims), jnp.float32)
    be2 = jnp.zeros((1, fc2_dims), jnp.float32)

    return (w1, b1, g1, be1, w2, b2, g2, be2, wm, bm)


def _layernorm_ref(h, gamma, beta):
    mean = jnp.mean(h, axis=-1, keepdims=True)
    var = jnp.mean((h - mean) * (h - mean), axis=-1, keepdims=True)
    return (h - mean) * jax.lax.rsqrt(var + LN_EPS) * gamma + beta


def reference_forward_f32(state, params):
    """Pure-f32 reference (module semantics, two-pass LayerNorm)."""
    (w1, b1, g1, be1, w2, b2, g2, be2, wm, bm) = params
    h = state @ w1 + b1
    h = jnp.maximum(_layernorm_ref(h, g1, be1), 0.0)
    h = h @ w2 + b2
    h = jnp.maximum(_layernorm_ref(h, g2, be2), 0.0)
    return jnp.tanh(h @ wm + bm)


def reference_forward_mixed(state, params):
    """Reference mirroring the kernel precision (bf16 matmuls, f32 LN)."""
    (w1, b1, g1, be1, w2, b2, g2, be2, wm, bm) = params
    h = jnp.dot(state.astype(jnp.bfloat16), w1.astype(jnp.bfloat16),
                preferred_element_type=jnp.float32) + b1
    h = jnp.maximum(_layernorm_fused(h, g1, be1, w1.shape[1]), 0.0)
    h = jnp.dot(h.astype(jnp.bfloat16), w2.astype(jnp.bfloat16),
                preferred_element_type=jnp.float32) + b2
    h = jnp.maximum(_layernorm_fused(h, g2, be2, w2.shape[1]), 0.0)
    h = jnp.dot(h.astype(jnp.bfloat16), wm.astype(jnp.bfloat16),
                preferred_element_type=jnp.float32) + bm
    return jnp.tanh(h)


if __name__ == "__main__":
    # Small shapes consistent with the module: batch=4, input_dims=32,
    # fc1_dims=64, fc2_dims=32, n_actions=8
    B, IN, H1, H2, A = 4, 32, 64, 32, 8

    key = jax.random.PRNGKey(0)
    k_state, k_params = jax.random.split(key)
    state = jax.random.normal(k_state, (B, IN), jnp.float32)
    params = init_params(k_params, IN, H1, H2, A)
    packed = pack_params(params)

    out = actor_forward(state, packed)
    out = jax.block_until_ready(out)
    assert out.shape == (B, A)

    ref_mixed = reference_forward_mixed(state, params)   # same bf16 matmul path
    ref_f32 = reference_forward_f32(state, params)       # full-precision semantics
    assert jnp.allclose(out, ref_mixed, atol=5e-3, rtol=5e-3), "mismatch vs mixed ref"
    assert jnp.allclose(out, ref_f32, atol=2e-2, rtol=2e-2), "mismatch vs f32 ref"

    # TODO(synk): optimizer (Adam) and checkpoint save/load are training/IO-side
    # and are not part of the forward kernel.
    print("KERNEL_OK")
</pallas_src>

<mosaic_0001>
module attributes {stable_mosaic.version = 11 : i64} {
  func.func @actor_kernel(%arg0: i32, %arg1: memref<16x32xf32, #tpu.memory_space<vmem>>, %arg2: memref<32x128xbf16, #tpu.memory_space<vmem>>, %arg3: memref<3x128xf32, #tpu.memory_space<vmem>>, %arg4: memref<128x128xbf16, #tpu.memory_space<vmem>>, %arg5: memref<3x128xf32, #tpu.memory_space<vmem>>, %arg6: memref<128x128xbf16, #tpu.memory_space<vmem>>, %arg7: memref<1x128xf32, #tpu.memory_space<vmem>>, %arg8: memref<16x128xbf16, #tpu.memory_space<vmem>>) attributes {dimension_semantics = [#tpu.dimension_semantics<parallel>], iteration_bounds = array<i64: 1>, scalar_prefetch = 0 : i64, scratch_operands = 0 : i64, tpu.core_type = #tpu.core_type<tc>, window_params = [{transform_indices = @transform_0, window_bounds = array<i64: 16, 32>}, {pipeline_mode = #tpu.pipeline_mode<synchronous>, transform_indices = @transform_1, window_bounds = array<i64: 32, 128>}, {pipeline_mode = #tpu.pipeline_mode<synchronous>, transform_indices = @transform_2, window_bounds = array<i64: 3, 128>}, {pipeline_mode = #tpu.pipeline_mode<synchronous>, transform_indices = @transform_3, window_bounds = array<i64: 128, 128>}, {pipeline_mode = #tpu.pipeline_mode<synchronous>, transform_indices = @transform_4, window_bounds = array<i64: 3, 128>}, {pipeline_mode = #tpu.pipeline_mode<synchronous>, transform_indices = @transform_5, window_bounds = array<i64: 128, 128>}, {pipeline_mode = #tpu.pipeline_mode<synchronous>, transform_indices = @transform_6, window_bounds = array<i64: 1, 128>}, {transform_indices = @transform_7, window_bounds = array<i64: 16, 128>}]} {
    %c0 = arith.constant 0 : index
    %c0_0 = arith.constant 0 : index
    %0 = vector.load %arg1[%c0, %c0_0] : memref<16x32xf32, #tpu.memory_space<vmem>>, vector<16x32xf32>
    %1 = arith.truncf %0 : vector<16x32xf32> to vector<16x32xbf16>
    %c0_1 = arith.constant 0 : index
    %c0_2 = arith.constant 0 : index
    %2 = vector.load %arg2[%c0_1, %c0_2] : memref<32x128xbf16, #tpu.memory_space<vmem>>, vector<32x128xbf16>
    %cst = arith.constant dense<0.000000e+00> : vector<16x128xf32>
    %3 = tpu.matmul %1, %2, %cst {dimension_numbers = #tpu.dot_dimension_numbers<[1], [0], [0], [1], [0, 0, 1, 1], [], []>} : vector<16x32xbf16>, vector<32x128xbf16>, vector<16x128xf32> -> vector<16x128xf32>
    %c0_3 = arith.constant 0 : index
    %c0_4 = arith.constant 0 : index
    %4 = vector.load %arg3[%c0_3, %c0_4] : memref<3x128xf32, #tpu.memory_space<vmem>>, vector<1x128xf32>
    %5 = vector.broadcast %4 : vector<1x128xf32> to vector<16x128xf32>
    %6 = arith.addf %3, %5 : vector<16x128xf32>
    %c1 = arith.constant 1 : index
    %c0_5 = arith.constant 0 : index
    %7 = vector.load %arg3[%c1, %c0_5] : memref<3x128xf32, #tpu.memory_space<vmem>>, vector<1x128xf32>
    %c2 = arith.constant 2 : index
    %c0_6 = arith.constant 0 : index
    %8 = vector.load %arg3[%c2, %c0_6] : memref<3x128xf32, #tpu.memory_space<vmem>>, vector<1x128xf32>
    %cst_7 = arith.constant dense<0.000000e+00> : vector<16xf32>
    %9 = vector.multi_reduction <add>, %6, %cst_7 [1] : vector<16x128xf32> to vector<16xf32>
    %10 = vector.shape_cast %9 : vector<16xf32> to vector<16x1xf32>
    %11 = arith.mulf %6, %6 : vector<16x128xf32>
    %cst_8 = arith.constant dense<0.000000e+00> : vector<16xf32>
    %12 = vector.multi_reduction <add>, %11, %cst_8 [1] : vector<16x128xf32> to vector<16xf32>
    %13 = vector.shape_cast %12 : vector<16xf32> to vector<16x1xf32>
    %cst_9 = arith.constant 1.562500e-02 : f32
    %14 = vector.broadcast %cst_9 : f32 to vector<16x1xf32>
    %15 = arith.mulf %10, %14 : vector<16x1xf32>
    %cst_10 = arith.constant 1.562500e-02 : f32
    %16 = vector.broadcast %cst_10 : f32 to vector<16x1xf32>
    %17 = arith.mulf %13, %16 : vector<16x1xf32>
    %18 = arith.mulf %15, %15 : vector<16x1xf32>
    %19 = arith.subf %17, %18 : vector<16x1xf32>
    %cst_11 = arith.constant 0.000000e+00 : f32
    %20 = vector.broadcast %cst_11 : f32 to vector<16x1xf32>
    %21 = arith.maximumf %19, %20 : vector<16x1xf32>
    %22 = vector.broadcast %15 : vector<16x1xf32> to vector<16x128xf32>
    %23 = arith.subf %6, %22 : vector<16x128xf32>
    %cst_12 = arith.constant 9.99999974E-6 : f32
    %24 = vector.broadcast %cst_12 : f32 to vector<16x1xf32>
    %25 = arith.addf %21, %24 : vector<16x1xf32>
    %26 = math.rsqrt %25 : vector<16x1xf32>
    %27 = vector.broadcast %26 : vector<16x1xf32> to vector<16x128xf32>
    %28 = arith.mulf %23, %27 : vector<16x128xf32>
    %29 = vector.broadcast %7 : vector<1x128xf32> to vector<16x128xf32>
    %30 = arith.mulf %28, %29 : vector<16x128xf32>
    %31 = vector.broadcast %8 : vector<1x128xf32> to vector<16x128xf32>
    %32 = arith.addf %30, %31 : vector<16x128xf32>
    %cst_13 = arith.constant 0.000000e+00 : f32
    %33 = vector.broadcast %cst_13 : f32 to vector<16x128xf32>
    %34 = arith.maximumf %32, %33 : vector<16x128xf32>
    %35 = arith.truncf %34 : vector<16x128xf32> to vector<16x128xbf16>
    %c0_14 = arith.constant 0 : index
    %c0_15 = arith.constant 0 : index
    %36 = vector.load %arg4[%c0_14, %c0_15] : memref<128x128xbf16, #tpu.memory_space<vmem>>, vector<128x128xbf16>
    %cst_16 = arith.constant dense<0.000000e+00> : vector<16x128xf32>
    %37 = tpu.matmul %35, %36, %cst_16 {dimension_numbers = #tpu.dot_dimension_numbers<[1], [0], [0], [1], [0, 0, 1, 1], [], []>} : vector<16x128xbf16>, vector<128x128xbf16>, vector<16x128xf32> -> vector<16x128xf32>
    %c0_17 = arith.constant 0 : index
    %c0_18 = arith.constant 0 : index
    %38 = vector.load %arg5[%c0_17, %c0_18] : memref<3x128xf32, #tpu.memory_space<vmem>>, vector<1x128xf32>
    %39 = vector.broadcast %38 : vector<1x128xf32> to vector<16x128xf32>
    %40 = arith.addf %37, %39 : vector<16x128xf32>
    %c1_19 = arith.constant 1 : index
    %c0_20 = arith.constant 0 : index
    %41 = vector.load %arg5[%c1_19, %c0_20] : memref<3x128xf32, #tpu.memory_space<vmem>>, vector<1x128xf32>
    %c2_21 = arith.constant 2 : index
    %c0_22 = arith.constant 0 : index
    %42 = vector.load %arg5[%c2_21, %c0_22] : memref<3x128xf32, #tpu.memory_space<vmem>>, vector<1x128xf32>
    %cst_23 = arith.constant dense<0.000000e+00> : vector<16xf32>
    %43 = vector.multi_reduction <add>, %40, %cst_23 [1] : vector<16x128xf32> to vector<16xf32>
    %44 = vector.shape_cast %43 : vector<16xf32> to vector<16x1xf32>
    %45 = arith.mulf %40, %40 : vector<16x128xf32>
    %cst_24 = arith.constant dense<0.000000e+00> : vector<16xf32>
    %46 = vector.multi_reduction <add>, %45, %cst_24 [1] : vector<16x128xf32> to vector<16xf32>
    %47 = vector.shape_cast %46 : vector<16xf32> to vector<16x1xf32>
    %cst_25 = arith.constant 3.125000e-02 : f32
    %48 = vector.broadcast %cst_25 : f32 to vector<16x1xf32>
    %49 = arith.mulf %44, %48 : vector<16x1xf32>
    %cst_26 = arith.constant 3.125000e-02 : f32
    %50 = vector.broadcast %cst_26 : f32 to vector<16x1xf32>
    %51 = arith.mulf %47, %50 : vector<16x1xf32>
    %52 = arith.mulf %49, %49 : vector<16x1xf32>
    %53 = arith.subf %51, %52 : vector<16x1xf32>
    %cst_27 = arith.constant 0.000000e+00 : f32
    %54 = vector.broadcast %cst_27 : f32 to vector<16x1xf32>
    %55 = arith.maximumf %53, %54 : vector<16x1xf32>
    %56 = vector.broadcast %49 : vector<16x1xf32> to vector<16x128xf32>
    %57 = arith.subf %40, %56 : vector<16x128xf32>
    %cst_28 = arith.constant 9.99999974E-6 : f32
    %58 = vector.broadcast %cst_28 : f32 to vector<16x1xf32>
    %59 = arith.addf %55, %58 : vector<16x1xf32>
    %60 = math.rsqrt %59 : vector<16x1xf32>
    %61 = vector.broadcast %60 : vector<16x1xf32> to vector<16x128xf32>
    %62 = arith.mulf %57, %61 : vector<16x128xf32>
    %63 = vector.broadcast %41 : vector<1x128xf32> to vector<16x128xf32>
    %64 = arith.mulf %62, %63 : vector<16x128xf32>
    %65 = vector.broadcast %42 : vector<1x128xf32> to vector<16x128xf32>
    %66 = arith.addf %64, %65 : vector<16x128xf32>
    %cst_29 = arith.constant 0.000000e+00 : f32
    %67 = vector.broadcast %cst_29 : f32 to vector<16x128xf32>
    %68 = arith.maximumf %66, %67 : vector<16x128xf32>
    %69 = arith.truncf %68 : vector<16x128xf32> to vector<16x128xbf16>
    %c0_30 = arith.constant 0 : index
    %c0_31 = arith.constant 0 : index
    %70 = vector.load %arg6[%c0_30, %c0_31] : memref<128x128xbf16, #tpu.memory_space<vmem>>, vector<128x128xbf16>
    %cst_32 = arith.constant dense<0.000000e+00> : vector<16x128xf32>
    %71 = tpu.matmul %69, %70, %cst_32 {dimension_numbers = #tpu.dot_dimension_numbers<[1], [0], [0], [1], [0, 0, 1, 1], [], []>} : vector<16x128xbf16>, vector<128x128xbf16>, vector<16x128xf32> -> vector<16x128xf32>
    %c0_33 = arith.constant 0 : index
    %c0_34 = arith.constant 0 : index
    %72 = vector.load %arg7[%c0_33, %c0_34] : memref<1x128xf32, #tpu.memory_space<vmem>>, vector<1x128xf32>
    %73 = vector.broadcast %72 : vector<1x128xf32> to vector<16x128xf32>
    %74 = arith.addf %71, %73 : vector<16x128xf32>
    %75 = math.tanh %74 : vector<16x128xf32>
    %76 = arith.truncf %75 : vector<16x128xf32> to vector<16x128xbf16>
    %c0_35 = arith.constant 0 : index
    %c0_36 = arith.constant 0 : index
    %77 = vector.load %arg8[%c0_35, %c0_36] : memref<16x128xbf16, #tpu.memory_space<vmem>>, vector<16x128xbf16>
    tpu.vector_store %arg8[%c0_35, %c0_36], %76 {strides = array<i32>} : memref<16x128xbf16, #tpu.memory_space<vmem>>, vector<16x128xbf16>,
    return
  }
  func.func @transform_0(%arg0: i32) -> (i32, i32) {
    %c0_i32 = arith.constant 0 : i32
    %c0_i32_0 = arith.constant 0 : i32
    return %arg0, %c0_i32 : i32, i32
  }
  func.func @transform_1(%arg0: i32) -> (i32, i32) {
    %c0_i32 = arith.constant 0 : i32
    %c0_i32_0 = arith.constant 0 : i32
    %c0_i32_1 = arith.constant 0 : i32
    return %c0_i32, %c0_i32_0 : i32, i32
  }
  func.func @transform_2(%arg0: i32) -> (i32, i32) {
    %c0_i32 = arith.constant 0 : i32
    %c0_i32_0 = arith.constant 0 : i32
    %c0_i32_1 = arith.constant 0 : i32
    return %c0_i32, %c0_i32_0 : i32, i32
  }
  func.func @transform_3(%arg0: i32) -> (i32, i32) {
    %c0_i32 = arith.constant 0 : i32
    %c0_i32_0 = arith.constant 0 : i32
    %c0_i32_1 = arith.constant 0 : i32
    return %c0_i32, %c0_i32_0 : i32, i32
  }
  func.func @transform_4(%arg0: i32) -> (i32, i32) {
    %c0_i32 = arith.constant 0 : i32
    %c0_i32_0 = arith.constant 0 : i32
    %c0_i32_1 = arith.constant 0 : i32
    return %c0_i32, %c0_i32_0 : i32, i32
  }
  func.func @transform_5(%arg0: i32) -> (i32, i32) {
    %c0_i32 = arith.constant 0 : i32
    %c0_i32_0 = arith.constant 0 : i32
    %c0_i32_1 = arith.constant 0 : i32
    return %c0_i32, %c0_i32_0 : i32, i32
  }
  func.func @transform_6(%arg0: i32) -> (i32, i32) {
    %c0_i32 = arith.constant 0 : i32
    %c0_i32_0 = arith.constant 0 : i32
    %c0_i32_1 = arith.constant 0 : i32
    return %c0_i32, %c0_i32_0 : i32, i32
  }
  func.func @transform_7(%arg0: i32) -> (i32, i32) {
    %c0_i32 = arith.constant 0 : i32
    %c0_i32_0 = arith.constant 0 : i32
    return %arg0, %c0_i32 : i32, i32
  }
}

</mosaic_0001>

<bundles_post_ra>
// kernel: tpu_custom_call.1
= control target key start
LH: loop header
LB: loop body
LE: loop exit
PB: predicated region body
PF: predicated region fallthrough
CT: control target
= control target key end

     0   :  { %12 = vsyncpa [#allocation3], 0  ;;  %s930_s0 = inlined_call_operand.hbm [shape: f32[16,32], index: 0, kind: input, shape index: {}]   ;;  %s931_s1 = inlined_call_operand.hbm [shape: bf16[32,128], index: 1, kind: input, shape index: {}]   ;;  %s932_s2 = inlined_call_operand.vmem [shape: f32[3,128], index: 2, kind: input, shape index: {}]   ;;  %s933_s3 = inlined_call_operand.hbm [shape: bf16[128,128], index: 3, kind: input, shape index: {}]   ;;  %s934_s4 = inlined_call_operand.vmem [shape: f32[3,128], index: 4, kind: input, shape index: {}]   ;;  %s935_s5 = inlined_call_operand.hbm [shape: bf16[128,128], index: 5, kind: input, shape index: {}]   ;;  %s936_s6 = inlined_call_operand.vmem [shape: f32[1,128], index: 6, kind: input, shape index: {}]   ;;  %s937_s7 = inlined_call_operand.hbm [shape: bf16[16,128], index: 7, kind: output, shape index: {}]  }
   0x1   :  { %13 = vsyncpa [#allocation6], 0 }
   0x2   :  { %14 = vsyncpa [#allocation9], 0 }
   0x3   :  { %15 = vsyncpa [#allocation4], 0  ;;  %s758_s24 = smov [#allocation5]   ;;  %s640_s28 = scalar_lea.hbm %s931_s1, 256 }
   0x4   :  { %s33_s25 = sshll.u32 %s758_s24, 4  ;;  %p641_p0 = scmp.ne.s32.totalorder %s931_s1, %s640_s28  ;;  %s34_s25 = int_to_ptr.vmem [resolvable:$true] %s33_s25 }
   0x5   :  { %p644_p1 = scmp.lt.u32.totalorder %s640_s28, %s931_s1 }
   0x7   :  { %p646_p2 = pnand %p644_p1, %p641_p0 }
   0x9   :  { %649 = shalt.err (!%p646_p2)
}
   0xa   :  { %s650_s10 = scalar_lea.vmem %s34_s25, 256  ;;  %p655_p4 = scmp.lt.s32.totalorder %s34_s25, %s34_s25 }
   0xb   :  { %p651_p3 = scmp.ne.s32.totalorder %s34_s25, %s650_s10  ;;  %p656_p5 = scmp.lt.s32.totalorder %s650_s10, %s650_s10 }
   0xd   :  { %p657_p6 = por %p656_p5, %p655_p4 }
   0xf   :  { %p658_p7 = pnand %p657_p6, %p651_p3 }
  0x11   :  { %661 = shalt.err (!%p658_p7)
}
  0x12   :  { %s759_s11 = smov 64   ;;  %s760_s12 = smov 4  }
  0x13   :  { %39 = dma.hbm_to_vmem [thread:$0]  %s931_s1, 256, %s34_s25, [#allocation6], %s759_s11, %s759_s11, %s760_s12  }
  0x14   :  { %s761_s15 = smov [#allocation2]   ;;  %s662_s19 = scalar_lea.hbm %s930_s0, 256 }
  0x15   :  { %s21_s16 = sshll.u32 %s761_s15, 4  ;;  %p663_p8 = scmp.ne.s32.totalorder %s930_s0, %s662_s19  ;;  %s22_s16 = int_to_ptr.vmem [resolvable:$true] %s21_s16 }
  0x16   :  { %p666_p9 = scmp.lt.u32.totalorder %s662_s19, %s930_s0 }
  0x18   :  { %p668_p10 = pnand %p666_p9, %p663_p8 }
  0x1a   :  { %671 = shalt.err (!%p668_p10)
}
  0x1b   :  { %s672_s24 = scalar_lea.vmem %s22_s16, 256  ;;  %p677_p12 = scmp.lt.s32.totalorder %s22_s16, %s22_s16 }
  0x1c   :  { %p673_p11 = scmp.ne.s32.totalorder %s22_s16, %s672_s24  ;;  %p678_p13 = scmp.lt.s32.totalorder %s672_s24, %s672_s24 }
  0x1e   :  { %p679_p0 = por %p678_p13, %p677_p12 }
  0x20   :  { %p680_p1 = pnand %p679_p0, %p673_p11 }
  0x22   :  { %683 = shalt.err (!%p680_p1)
}
  0x23   :  { %s762_s1 = smov 128   ;;  %s763_s25 = smov 8  }
  0x24   :  { %27 = dma.hbm_to_vmem [thread:$0]  %s930_s0, 256, %s22_s16, [#allocation3], %s762_s1, %s762_s1, %s763_s25  }
  0x25   :  { %s764_s28 = smov [#allocation7]   ;;  %s765_s30 = smov [#allocation8]  }
  0x26   :  { %s47_s29 = sshll.u32 %s764_s28, 4  ;;  %s61_s8 = sshll.u32 %s765_s30, 4  ;;  %s48_s29 = int_to_ptr.vmem [resolvable:$true] %s47_s29  ;;  %s836_s8 = int_to_ptr.vmem [resolvable:$true] %s61_s8 }
  0x27   :  { %s684_s13 = scalar_lea.hbm %s933_s3, 1024 }
  0x28   :  { %p685_p2 = scmp.ne.s32.totalorder %s933_s3, %s684_s13  ;;  %p688_p3 = scmp.lt.u32.totalorder %s684_s13, %s933_s3 }
  0x2a   :  { %p690_p4 = pnand %p688_p3, %p685_p2 }
  0x2c   :  { %693 = shalt.err (!%p690_p4)
}
  0x2d   :  { %s694_s0 = scalar_lea.vmem %s48_s29, 1024  ;;  %p699_p6 = scmp.lt.s32.totalorder %s48_s29, %s48_s29 }
  0x2e   :  { %p695_p5 = scmp.ne.s32.totalorder %s48_s29, %s694_s0  ;;  %p700_p7 = scmp.lt.s32.totalorder %s694_s0, %s694_s0 }
  0x30   :  { %p701_p8 = por %p700_p7, %p699_p6 }
  0x32   :  { %p702_p9 = pnand %p701_p8, %p695_p5 }
  0x34   :  { %705 = shalt.err (!%p702_p9)
}
  0x35   :  { %53 = dma.hbm_to_vmem [thread:$0]  %s933_s3, 1024, %s48_s29, [#allocation6], %s759_s11, %s759_s11, %s760_s12  }
  0x36   :  { %s706_s22 = scalar_lea.hbm %s935_s5, 1024 }
  0x37   :  { %p707_p10 = scmp.ne.s32.totalorder %s935_s5, %s706_s22  ;;  %p710_p11 = scmp.lt.u32.totalorder %s706_s22, %s935_s5 }
  0x39   :  { %p712_p12 = pnand %p710_p11, %p707_p10 }
  0x3b   :  { %715 = shalt.err (!%p712_p12)
}
  0x3c   :  { %s716_s26 = scalar_lea.vmem %s836_s8, 1024  ;;  %p721_p0 = scmp.lt.s32.totalorder %s836_s8, %s836_s8 }
  0x3d   :  { %p717_p13 = scmp.ne.s32.totalorder %s836_s8, %s716_s26  ;;  %p722_p1 = scmp.lt.s32.totalorder %s716_s26, %s716_s26 }
  0x3f   :  { %p723_p2 = por %p722_p1, %p721_p0 }
  0x41   :  { %p724_p3 = pnand %p723_p2, %p717_p13 }
  0x43   :  { %727 = shalt.err (!%p724_p3)
}
  0x44   :  { %67 = dma.hbm_to_vmem [thread:$0]  %s935_s5, 1024, %s836_s8, [#allocation9], %s759_s11, %s759_s11, %s760_s12  }
  0x45   :  { %750 = dma.done.wait [#allocation3], 256  }
  0x46   :  { %751 = vsyncadd [#allocation3], 4294967040 }
  0x47   :  { %752 = dma.done.wait [#allocation6], 1280  }
  0x48   :  { %753 = vsyncadd [#allocation6], 4294966016 }
  0x49   :  { %754 = dma.done.wait [#allocation9], 1024  }
  0x4a   :  { %755 = vsyncadd [#allocation9], 4294966272  ;;  %v766_v0 = vmov 0.0   ;;  %vm767_vm0 = vmmov 0   ;;  %v610_v1 = vld [vmem:[#allocation5] sm:$0xff]   ;;  %v611_v2 = vld [vmem:[#allocation5 + $0x8] sm:$0xff]  }
  0x4b   :  { %551 = vmatprep.subr.bf16.mxu0 %v766_v0  ;;  %555 = vmatprep.mubr.msk.bf16.mxu0 %vm767_vm0, %v766_v0  ;;  %v83_v3 = vld [vmem:[#allocation2] sm:$0xff]  ;;  %v84_v4 = vld [vmem:[#allocation2 + $0x8] sm:$0xff]  ;;  %vm107_vm1 = vcmask 261120   ;;  %v614_v17 = vld [vmem:[#allocation7 + $0x10] sm:$0xff]  }
  0x4c   :  { %559 = vmatprep.subr.bf16.mxu1 %v766_v0  ;;  %575 = vmatprep.mubr.msk.bf16.mxu1 %vm767_vm0, %v766_v0  ;;  %v85_v5 = vpack.c.bf16 %v84_v4, %v83_v3  ;;  %v495_v6 = vld [vmem:[%s932_s2] ss:$0 sm:$0xff]  ;;  %v613_v16 = vld [vmem:[#allocation7 + $0x8] sm:$0xff]   ;;  %v615_v18 = vld [vmem:[#allocation7 + $0x18] sm:$0xff]  }
  0x4d   :  { %552 = vmatpush3.bf16.msra.mxu0 %v610_v1  ;;  %v612_v15 = vld [vmem:[#allocation7] sm:$0xff]   ;;  %v617_v20 = vld [vmem:[#allocation7 + $0x28] sm:$0xff]   ;;  %v618_v21 = vld [vmem:[#allocation7 + $0x30] sm:$0xff]  }
  0x4e   :  { %553 = vmatprep.subr.bf16.mxu0 %v766_v0  ;;  %560 = vmatpush3.bf16.msra.mxu1 %v612_v15  ;;  %v616_v19 = vld [vmem:[#allocation7 + $0x20] sm:$0xff]   ;;  %v619_v22 = vld [vmem:[#allocation7 + $0x38] sm:$0xff]   ;;  %v621_v1 = vld [vmem:[#allocation8 + $0x8] sm:$0xff]  }
  0x4f   :  { %561 = vmatprep.subr.bf16.mxu1 %v766_v0  ;;  %v499_v41 = vld [vmem:[%s932_s2 + $0x1] ss:$0 sm:$0xff]  ;;  %v500_v46 = vld [vmem:[%s932_s2 + $0x2] ss:$0 sm:$0xff]  ;;  %v501_v54 = vld [vmem:[%s934_s4] ss:$0 sm:$0xff] }
  0x50   :  { %v620_v63 = vld [vmem:[#allocation8] sm:$0xff]   ;;  %v623_v3 = vld [vmem:[#allocation8 + $0x18] sm:$0xff]  }
  0x51   :  { %554 = vmatpush3.bf16.msra.mxu0 %v611_v2  ;;  %v622_v2 = vld [vmem:[#allocation8 + $0x10] sm:$0xff]   ;;  %v624_v4 = vld [vmem:[#allocation8 + $0x20] sm:$0xff]  }
  0x52   :  { %579 = vmatprep.subr.bf16.mxu0 %v766_v0  ;;  %562 = vmatpush3.bf16.msra.mxu1 %v613_v16 }
  0x53   :  { %563 = vmatprep.subr.bf16.mxu1 %v766_v0 }
  0x54   :  { %556 = vmatmul.mubr.msk.bf16.vlgmr.msra.gmra.mrb[0].mxu0 %vm107_vm1, %v85_v5  ;;  %v625_v5 = vld [vmem:[#allocation8 + $0x28] sm:$0xff]  }
  0x55   :  { %595 = vmatprep.mubr.msk.bf16.mxu0 %vm767_vm0, %v766_v0  ;;  %580 = vmatpush3.bf16.msra.mxu0 %v620_v63 }
  0x56   :  { %564 = vmatpush3.bf16.msra.mxu1 %v614_v17  ;;  %581 = vmatprep.subr.bf16.mxu0 %v766_v0 }
  0x57   :  { %565 = vmatprep.subr.bf16.mxu1 %v766_v0 }
  0x59   :  { %582 = vmatpush3.bf16.msra.mxu0 %v621_v1 }
  0x5a   :  { %566 = vmatpush3.bf16.msra.mxu1 %v615_v18  ;;  %583 = vmatprep.subr.bf16.mxu0 %v766_v0 }
  0x5b   :  { %567 = vmatprep.subr.bf16.mxu1 %v766_v0 }
  0x5d   :  { %584 = vmatpush3.bf16.msra.mxu0 %v622_v2 }
  0x5e   :  { %568 = vmatpush3.bf16.msra.mxu1 %v616_v19  ;;  %585 = vmatprep.subr.bf16.mxu0 %v766_v0 }
  0x5f   :  { %569 = vmatprep.subr.bf16.mxu1 %v766_v0 }
  0x61   :  { %586 = vmatpush3.bf16.msra.mxu0 %v623_v3 }
  0x62   :  { %570 = vmatpush3.bf16.msra.mxu1 %v617_v20  ;;  %587 = vmatprep.subr.bf16.mxu0 %v766_v0 }
  0x63   :  { %571 = vmatprep.subr.bf16.mxu1 %v766_v0 }
  0x65   :  { %588 = vmatpush3.bf16.msra.mxu0 %v624_v4 }
  0x66   :  { %572 = vmatpush3.bf16.msra.mxu1 %v618_v21  ;;  %589 = vmatprep.subr.bf16.mxu0 %v766_v0 }
  0x67   :  { %573 = vmatprep.subr.bf16.mxu1 %v766_v0 }
  0x69   :  { %590 = vmatpush3.bf16.msra.mxu0 %v625_v5 }
  0x6a   :  { %574 = vmatpush3.bf16.msra.mxu1 %v619_v22  ;;  %591 = vmatprep.subr.bf16.mxu0 %v766_v0 }
 0x127   :  { %v145_v7 = vpop.f32.mrb[0].mxu0 }
 0x128   :  { %v146_v8 = vadd.f32 %v495_v6, %v145_v7  ;;  %v557_v9 = vpop.f32.mrb[1].mxu0  ;;  %v627_v7 = vld [vmem:[#allocation8 + $0x38] sm:$0xff]  }
 0x129   :  { %v148_v10 = vpop.f32.mrb[2].mxu0 }
 0x12a   :  { %v149_v11 = vadd.f32 %v495_v6, %v148_v10  ;;  %154 = vadd.xlane.f32.xlu0 %v146_v8  ;;  %v558_v12 = vpop.f32.mrb[3].mxu0  ;;  %v158_v13 = vmul.f32 %v146_v8, %v146_v8  ;;  %v626_v6 = vld [vmem:[#allocation8 + $0x30] sm:$0xff]  }
 0x12b   :  { %592 = vmatpush3.bf16.msra.mxu0 %v626_v6 }
 0x12c   :  { %160 = vadd.xlane.f32.xlu1 %v158_v13  ;;  %v159_v14 = vmul.f32 %v149_v11, %v149_v11  ;;  %593 = vmatprep.subr.bf16.mxu0 %v766_v0 }
 0x12e   :  { %156 = vadd.xlane.f32.xlu0 %v149_v11 }
 0x12f   :  { %594 = vmatpush3.bf16.msra.mxu0 %v627_v7 }
 0x130   :  { %162 = vadd.xlane.f32.xlu1 %v159_v14 }
 0x1b7   :  { %v155_v23 = vpop.xlane.xlu0 %154 }
 0x1b8   :  { %v164_v24 = vmul.f32 0.015625, %v155_v23 }
 0x1b9   :  { %v161_v25 = vpop.xlane.xlu1 %160 }
 0x1ba   :  { %v168_v26 = vmul.f32 %v164_v24, %v164_v24  ;;  %v166_v27 = vmul.f32 0.015625, %v161_v25  ;;  %v174_v39 = vsub.f32 %v146_v8, %v164_v24  ;;  %v510_v25 = vld [vmem:[%s934_s4 + $0x1] ss:$0 sm:$0xff] }
 0x1bb   :  { %v157_v28 = vpop.xlane.xlu0 %156 }
 0x1bc   :  { %v170_v29 = vsub.f32 %v166_v27, %v168_v26  ;;  %v165_v30 = vmul.f32 0.015625, %v157_v28 }
 0x1bd   :  { %v163_v31 = vpop.xlane.xlu1 %162 }
 0x1be   :  { %v172_v32 = vmax.f32 %v170_v29, 0.0  ;;  %v169_v33 = vmul.f32 %v165_v30, %v165_v30  ;;  %v167_v34 = vmul.f32 0.015625, %v163_v31  ;;  %v175_v43 = vsub.f32 %v149_v11, %v165_v30  ;;  %v511_v29 = vld [vmem:[%s934_s4 + $0x2] ss:$0 sm:$0xff]  ;;  %s768_s4 = smov [#allocation10]  }
 0x1bf   :  { %s481_s16 = sshll.u32 %s768_s4, 4  ;;  %s482_s16 = int_to_ptr.vmem [resolvable:$true] %s481_s16 }
 0x1c0   :  { %v176_v35 = vadd.f32 1e-05, %v172_v32  ;;  %v171_v36 = vsub.f32 %v167_v34, %v169_v33  ;;  %s728_s19 = scalar_lea.vmem %s482_s16, 128  ;;  %p733_p5 = scmp.lt.s32.totalorder %s482_s16, %s482_s16 }
 0x1c1   :  { %p729_p4 = scmp.ne.s32.totalorder %s482_s16, %s728_s19  ;;  %p734_p6 = scmp.lt.s32.totalorder %s728_s19, %s728_s19 }
 0x1c2   :  { %628 = vrsqrt.f32 %v176_v35  ;;  %v173_v37 = vmax.f32 %v171_v36, 0.0 }
 0x1c3   :  { %p735_p7 = por %p734_p6, %p733_p5 }
 0x1c4   :  { %v177_v38 = vadd.f32 1e-05, %v173_v37 }
 0x1c5   :  { %p736_p8 = pnand %p735_p7, %p729_p4 }
 0x1c6   :  { %630 = vrsqrt.f32 %v177_v38  ;;  %v512_v38 = vld [vmem:[%s936_s6] ss:$0 sm:$0xff] }
 0x1cc   :  { %v629_v40 = vpop.eup %628 }
 0x1cd   :  { %v180_v42 = vmul.f32 %v629_v40, %v174_v39 }
 0x1cf   :  { %v186_v44 = vmul.f32 %v499_v41, %v180_v42 }
 0x1d0   :  { %v631_v45 = vpop.eup %630 }
 0x1d1   :  { %v181_v47 = vmul.f32 %v631_v45, %v175_v43  ;;  %v192_v49 = vadd.f32 %v500_v46, %v186_v44 }
 0x1d3   :  { %v187_v48 = vmul.f32 %v499_v41, %v181_v47  ;;  %v194_v51 = vmax.f32 %v192_v49, 0.0 }
 0x1d5   :  { %v193_v50 = vadd.f32 %v500_v46, %v187_v48 }
 0x1d7   :  { %v195_v52 = vmax.f32 %v193_v50, 0.0 }
 0x1d9   :  { %v196_v53 = vpack.c.bf16 %v195_v52, %v194_v51 }
 0x1db   :  { %576 = vmatmul.mubr.bf16.vlgmr.msra.gmra.mrb[0].mxu1 %v196_v53 }
 0x2ae   :  { %v300_v55 = vpop.f32.mrb[0].mxu1 }
 0x2af   :  { %v301_v56 = vadd.f32 %v501_v54, %v300_v55  ;;  %v577_v57 = vpop.f32.mrb[1].mxu1 }
 0x2b0   :  { %v303_v58 = vpop.f32.mrb[2].mxu1 }
 0x2b1   :  { %v304_v59 = vadd.f32 %v501_v54, %v303_v58  ;;  %309 = vadd.xlane.f32.xlu0 %v301_v56  ;;  %v578_v60 = vpop.f32.mrb[3].mxu1  ;;  %v313_v61 = vmul.f32 %v301_v56, %v301_v56 }
 0x2b3   :  { %311 = vadd.xlane.f32.xlu1 %v304_v59  ;;  %v314_v62 = vmul.f32 %v304_v59, %v304_v59 }
 0x2b5   :  { %315 = vadd.xlane.f32.xlu0 %v313_v61 }
 0x2b7   :  { %317 = vadd.xlane.f32.xlu1 %v314_v62 }
 0x33e   :  { %v310_v8 = vpop.xlane.xlu0 %309 }
 0x33f   :  { %v319_v9 = vmul.f32 0.03125, %v310_v8 }
 0x340   :  { %v312_v10 = vpop.xlane.xlu1 %311 }
 0x341   :  { %v320_v11 = vmul.f32 0.03125, %v312_v10  ;;  %v323_v13 = vmul.f32 %v319_v9, %v319_v9  ;;  %v329_v0 = vsub.f32 %v301_v56, %v319_v9 }
 0x342   :  { %v316_v12 = vpop.xlane.xlu0 %315 }
 0x343   :  { %v321_v14 = vmul.f32 0.03125, %v316_v12  ;;  %v324_v16 = vmul.f32 %v320_v11, %v320_v11  ;;  %v330_v26 = vsub.f32 %v304_v59, %v320_v11 }
 0x344   :  { %v318_v15 = vpop.xlane.xlu1 %317 }
 0x345   :  { %v325_v17 = vsub.f32 %v321_v14, %v323_v13  ;;  %v322_v18 = vmul.f32 0.03125, %v318_v15 }
 0x347   :  { %v327_v19 = vmax.f32 %v325_v17, 0.0  ;;  %v326_v20 = vsub.f32 %v322_v18, %v324_v16 }
 0x349   :  { %v331_v21 = vadd.f32 1e-05, %v327_v19  ;;  %v328_v22 = vmax.f32 %v326_v20, 0.0 }
 0x34b   :  { %632 = vrsqrt.f32 %v331_v21  ;;  %v332_v23 = vadd.f32 1e-05, %v328_v22 }
 0x34d   :  { %634 = vrsqrt.f32 %v332_v23 }
 0x355   :  { %v633_v24 = vpop.eup %632 }
 0x356   :  { %v335_v27 = vmul.f32 %v633_v24, %v329_v0 }
 0x357   :  { %v635_v28 = vpop.eup %634 }
 0x358   :  { %v336_v30 = vmul.f32 %v635_v28, %v330_v26  ;;  %v341_v31 = vmul.f32 %v510_v25, %v335_v27 }
 0x35a   :  { %v342_v32 = vmul.f32 %v510_v25, %v336_v30  ;;  %v347_v33 = vadd.f32 %v511_v29, %v341_v31 }
 0x35c   :  { %v348_v34 = vadd.f32 %v511_v29, %v342_v32  ;;  %v349_v35 = vmax.f32 %v347_v33, 0.0 }
 0x35e   :  { %v350_v36 = vmax.f32 %v348_v34, 0.0 }
 0x360   :  { %v351_v37 = vpack.c.bf16 %v350_v36, %v349_v35 }
 0x362   :  { %596 = vmatmul.mubr.bf16.vlgmr.msra.gmra.mrb[4].mxu0 %v351_v37 }
 0x435   :  { %v457_v39 = vpop.f32.mrb[4].mxu0 }
 0x436   :  { %v458_v40 = vadd.f32 %v512_v38, %v457_v39  ;;  %v597_v41 = vpop.f32.mrb[5].mxu0 }
 0x437   :  { %v460_v42 = vpop.f32.mrb[6].mxu0 }
 0x438   :  { %v461_v43 = vadd.f32 %v512_v38, %v460_v42  ;;  %v598_v44 = vpop.f32.mrb[7].mxu0  ;;  %636 = vtanh.f32 %v458_v40 }
 0x43a   :  { %638 = vtanh.f32 %v461_v43 }
 0x442   :  { %v637_v45 = vpop.eup %636 }
 0x444   :  { %v639_v46 = vpop.eup %638 }
 0x445   :  { %v528_v47 = vpack.c.bf16 %v639_v46, %v637_v45 }
 0x447   :  { %529 = vst [vmem:[#allocation10] sm:$0xff] %v528_v47  }
 0x448   :  { %739 = shalt.err (!%p736_p8)
}
 0x449   :  { %s740_s21 = scalar_lea.hbm %s937_s7, 128 }
 0x44a   :  { %p741_p9 = scmp.ne.s32.totalorder %s937_s7, %s740_s21  ;;  %p744_p10 = scmp.lt.u32.totalorder %s740_s21, %s937_s7 }
 0x44c   :  { %p746_p11 = pnand %p744_p10, %p741_p9 }
 0x44e   :  { %749 = shalt.err (!%p746_p11)
}
 0x44f   :  { %487 = dma.vmem_to_hbm [thread:$0]  %s482_s16, 128, %s937_s7, [#allocation4], %s759_s11, %s759_s11, %s760_s12  }
 0x450   :  { %756 = dma.done.wait [#allocation4], 128  }
 0x451   :  { %757 = vsyncadd [#allocation4], 4294967168 }
 0x452   :  { %491 = vsyncpa [#allocation3], 1 }
 0x453   :  { %492 = vsyncpa [#allocation6], 1 }
 0x454   :  { %493 = vsyncpa [#allocation9], 1 }
 0x455   :  { %494 = vsyncpa [#allocation4], 1 }

</bundles_post_ra>
